<compile_context>
chip_gen: v5e
topology: v5e:2x2
jax: 0.10.0
libtpu: 0.0.40
codegen_flags: <defaults>
</compile_context>

<pallas_src>
import jax
import jax.numpy as jnp
from jax.experimental import pallas as pl
from jax.experimental.pallas import tpu as pltpu


def _round_up(x: int, m: int) -> int:
    return (x + m - 1) // m * m


def _pad2d(a, rows: int, cols: int):
    pr, pc = rows - a.shape[0], cols - a.shape[1]
    if pr or pc:
        a = jnp.pad(a, ((0, pr), (0, pc)))
    return a


def mlp_kernel(x_ref, w1_ref, b1_ref, w2_ref, b2_ref, o_ref, h_ref):
    # First matmul on the MXU: bf16 operands, f32 accumulation. x arrives in its native
    # dtype; the bf16 cast is cheap VPU work hidden under the MXU.
    x = x_ref[...].astype(jnp.bfloat16)
    h = jnp.dot(x, w1_ref[...], preferred_element_type=jnp.float32)
    # Bias + ReLU in f32 on the VPU (safe on v5e, which has no bf16 VPU/EUP); stage the
    # activation in bf16 -> half the scratch VMEM and half the vst/vld traffic through
    # the single primary vector-store slot.
    h_ref[...] = jnp.maximum(h + b1_ref[...], 0.0).astype(jnp.bfloat16)
    # Second matmul over the lane-padded action dim, then store only the real actions
    # (the output block's last dim equals the full unpadded action dim, so no padded
    # output slab ever hits HBM).
    y = jnp.dot(h_ref[...], w2_ref[...], preferred_element_type=jnp.float32)
    y = y + b2_ref[...]
    o_ref[...] = y[:, : o_ref.shape[-1]].astype(o_ref.dtype)


def prepare_params(w1, b1, w2, b2):
    """One-time parameter prep (hoisted out of the per-step forward): pad hidden and
    n_actions up to 128-lane multiples and cast weights to bf16. Reuse the result."""
    obs, hidden = w1.shape
    n_actions = w2.shape[1]
    hidden_p = _round_up(hidden, 128)
    nact_p = _round_up(n_actions, 128)
    return {
        "w1": _pad2d(w1, obs, hidden_p).astype(jnp.bfloat16),
        "b1": _pad2d(jnp.reshape(b1, (1, -1)), 1, hidden_p).astype(jnp.float32),
        "w2": _pad2d(w2, hidden_p, nact_p).astype(jnp.bfloat16),
        "b2": _pad2d(jnp.reshape(b2, (1, -1)), 1, nact_p).astype(jnp.float32),
        "obs": obs,
        "hidden_p": hidden_p,
        "nact_p": nact_p,
        "n_actions": n_actions,
    }


def cross_entropy_network_forward(x, params, *, block_b=None):
    """y = relu(x @ W1 + b1) @ W2 + b2 for x: (B, obs). `params` from prepare_params()."""
    B, obs = x.shape
    assert obs == params["obs"]
    hidden_p = params["hidden_p"]
    nact_p = params["nact_p"]
    n_actions = params["n_actions"]
    out_dtype = x.dtype

    # --- batch tiling ----------------------------------------------------------------
    b8 = _round_up(B, 8)
    if block_b is None:
        # Large tiles amortize the ~0.35us/grid-step overhead (per-step compute here is
        # tiny), but keep >= 2 grid steps when the batch allows so the "parallel" batch
        # axis can shard across v7x's two TensorCores.
        block_b = min(4096, b8)
        if block_b == b8 and b8 >= 16:
            block_b = _round_up(pl.cdiv(b8, 2), 8)
    else:
        block_b = _round_up(block_b, 8)
    B_p = _round_up(B, block_b)
    grid = (B_p // block_b,)

    x_p = _pad2d(x, B_p, obs)  # native dtype; cast to bf16 inside the kernel

    # --- VMEM budget (honest: double-buffered I/O tiles + resident weights + scratch) -
    bytes_needed = (
        2 * block_b * obs * x.dtype.itemsize          # x tiles (double-buffered)
        + 2 * block_b * n_actions * 4                 # narrow f32 output tiles
        + 2 * (obs * hidden_p * 2 + hidden_p * 4      # W1 / b1 (constant index_map, so
               + hidden_p * nact_p * 2 + nact_p * 4)  #  never re-fetched, but budgeted)
        + block_b * hidden_p * 2                      # bf16 hidden scratch
    )
    vmem_limit = int(min(max(bytes_needed * 3 // 2, 4 * 1024 * 1024),
                         48 * 1024 * 1024))

    out_p = pl.pallas_call(
        mlp_kernel,
        out_shape=jax.ShapeDtypeStruct((B_p, n_actions), out_dtype),
        grid_spec=pltpu.PrefetchScalarGridSpec(
            num_scalar_prefetch=0,
            grid=grid,
            in_specs=[
                pl.BlockSpec((block_b, obs), lambda i: (i, 0)),      # x tile over batch
                pl.BlockSpec((obs, hidden_p), lambda i: (0, 0)),     # W1 (resident)
                pl.BlockSpec((1, hidden_p), lambda i: (0, 0)),       # b1
                pl.BlockSpec((hidden_p, nact_p), lambda i: (0, 0)),  # W2 (resident)
                pl.BlockSpec((1, nact_p), lambda i: (0, 0)),         # b2
            ],
            # Narrow output block: last dim equals the full (unpadded) action dim, so no
            # 128-lane padded slab is written to HBM or re-sliced in the wrapper.
            out_specs=pl.BlockSpec((block_b, n_actions), lambda i: (i, 0)),
            scratch_shapes=[pltpu.VMEM((block_b, hidden_p), jnp.bfloat16)],
        ),
        compiler_params=pltpu.CompilerParams(
            dimension_semantics=("parallel",),
            vmem_limit_bytes=vmem_limit,
        ),
    )(x_p, params["w1"], params["b1"], params["w2"], params["b2"])

    # Strip batch padding only (no action padding exists in the output anymore).
    return out_p[:B] if B_p != B else out_p


def init_params(key, obs_size, hidden_size, n_actions, dtype=jnp.float32):
    """Deterministic PyTorch-style (kaiming-uniform-ish) init; weights kept as (in, out)."""
    k1, k2, k3, k4 = jax.random.split(key, 4)
    bound1 = 1.0 / jnp.sqrt(obs_size)
    bound2 = 1.0 / jnp.sqrt(hidden_size)
    w1 = jax.random.uniform(k1, (obs_size, hidden_size), dtype, -bound1, bound1)
    b1 = jax.random.uniform(k2, (1, hidden_size), dtype, -bound1, bound1)
    w2 = jax.random.uniform(k3, (hidden_size, n_actions), dtype, -bound2, bound2)
    b2 = jax.random.uniform(k4, (1, n_actions), dtype, -bound2, bound2)
    return w1, b1, w2, b2


if __name__ == "__main__":
    # Small shapes consistent with a CartPole-style cross-entropy policy net.
    batch, obs_size, hidden_size, n_actions = 8, 4, 32, 2

    key = jax.random.PRNGKey(0)
    kx, kp = jax.random.split(key)
    x = jax.random.normal(kx, (batch, obs_size), dtype=jnp.float32)
    w1, b1, w2, b2 = init_params(kp, obs_size, hidden_size, n_actions)

    params = prepare_params(w1, b1, w2, b2)          # one-time prep, reused across calls
    out = cross_entropy_network_forward(x, params)
    out = jax.block_until_ready(out)

    # Pure-JAX f32 reference; loose tolerance because the kernel uses bf16 MXU operands.
    ref = jnp.maximum(x @ w1 + b1, 0.0) @ w2 + b2
    assert out.shape == (batch, n_actions)
    assert jnp.allclose(out, ref, atol=5e-2, rtol=5e-2), (
        f"max abs err {jnp.max(jnp.abs(out - ref))}")

    print("KERNEL_OK")
</pallas_src>

<mosaic_0001>
module attributes {stable_mosaic.version = 11 : i64} {
  func.func @mlp_kernel(%arg0: i32, %arg1: memref<8x4xf32, #tpu.memory_space<vmem>>, %arg2: memref<4x128xbf16, #tpu.memory_space<vmem>>, %arg3: memref<1x128xf32, #tpu.memory_space<vmem>>, %arg4: memref<128x128xbf16, #tpu.memory_space<vmem>>, %arg5: memref<1x128xf32, #tpu.memory_space<vmem>>, %arg6: memref<8x2xf32, #tpu.memory_space<vmem>>, %arg7: memref<8x128xbf16, #tpu.memory_space<vmem>>) attributes {dimension_semantics = [#tpu.dimension_semantics<parallel>], iteration_bounds = array<i64: 1>, scalar_prefetch = 0 : i64, scratch_operands = 1 : i64, tpu.core_type = #tpu.core_type<tc>, window_params = [{transform_indices = @transform_0, window_bounds = array<i64: 8, 4>}, {pipeline_mode = #tpu.pipeline_mode<synchronous>, transform_indices = @transform_1, window_bounds = array<i64: 4, 128>}, {pipeline_mode = #tpu.pipeline_mode<synchronous>, transform_indices = @transform_2, window_bounds = array<i64: 1, 128>}, {pipeline_mode = #tpu.pipeline_mode<synchronous>, transform_indices = @transform_3, window_bounds = array<i64: 128, 128>}, {pipeline_mode = #tpu.pipeline_mode<synchronous>, transform_indices = @transform_4, window_bounds = array<i64: 1, 128>}, {transform_indices = @transform_5, window_bounds = array<i64: 8, 2>}]} {
    %c0 = arith.constant 0 : index
    %c0_0 = arith.constant 0 : index
    %0 = vector.load %arg1[%c0, %c0_0] : memref<8x4xf32, #tpu.memory_space<vmem>>, vector<8x4xf32>
    %1 = arith.truncf %0 : vector<8x4xf32> to vector<8x4xbf16>
    %c0_1 = arith.constant 0 : index
    %c0_2 = arith.constant 0 : index
    %2 = vector.load %arg2[%c0_1, %c0_2] : memref<4x128xbf16, #tpu.memory_space<vmem>>, vector<4x128xbf16>
    %cst = arith.constant dense<0.000000e+00> : vector<8x128xf32>
    %3 = tpu.matmul %1, %2, %cst {dimension_numbers = #tpu.dot_dimension_numbers<[1], [0], [0], [1], [0, 0, 1, 1], [], []>} : vector<8x4xbf16>, vector<4x128xbf16>, vector<8x128xf32> -> vector<8x128xf32>
    %c0_3 = arith.constant 0 : index
    %c0_4 = arith.constant 0 : index
    %4 = vector.load %arg3[%c0_3, %c0_4] : memref<1x128xf32, #tpu.memory_space<vmem>>, vector<1x128xf32>
    %5 = vector.broadcast %4 : vector<1x128xf32> to vector<8x128xf32>
    %6 = arith.addf %3, %5 : vector<8x128xf32>
    %cst_5 = arith.constant 0.000000e+00 : f32
    %7 = vector.broadcast %cst_5 : f32 to vector<8x128xf32>
    %8 = arith.maximumf %6, %7 : vector<8x128xf32>
    %9 = arith.truncf %8 : vector<8x128xf32> to vector<8x128xbf16>
    %c0_6 = arith.constant 0 : index
    %c0_7 = arith.constant 0 : index
    %10 = vector.load %arg7[%c0_6, %c0_7] : memref<8x128xbf16, #tpu.memory_space<vmem>>, vector<8x128xbf16>
    tpu.vector_store %arg7[%c0_6, %c0_7], %9 {strides = array<i32>} : memref<8x128xbf16, #tpu.memory_space<vmem>>, vector<8x128xbf16>,
    %c0_8 = arith.constant 0 : index
    %c0_9 = arith.constant 0 : index
    %11 = vector.load %arg7[%c0_8, %c0_9] : memref<8x128xbf16, #tpu.memory_space<vmem>>, vector<8x128xbf16>
    %c0_10 = arith.constant 0 : index
    %c0_11 = arith.constant 0 : index
    %12 = vector.load %arg4[%c0_10, %c0_11] : memref<128x128xbf16, #tpu.memory_space<vmem>>, vector<128x128xbf16>
    %cst_12 = arith.constant dense<0.000000e+00> : vector<8x128xf32>
    %13 = tpu.matmul %11, %12, %cst_12 {dimension_numbers = #tpu.dot_dimension_numbers<[1], [0], [0], [1], [0, 0, 1, 1], [], []>} : vector<8x128xbf16>, vector<128x128xbf16>, vector<8x128xf32> -> vector<8x128xf32>
    %c0_13 = arith.constant 0 : index
    %c0_14 = arith.constant 0 : index
    %14 = vector.load %arg5[%c0_13, %c0_14] : memref<1x128xf32, #tpu.memory_space<vmem>>, vector<1x128xf32>
    %15 = vector.broadcast %14 : vector<1x128xf32> to vector<8x128xf32>
    %16 = arith.addf %13, %15 : vector<8x128xf32>
    %17 = vector.extract_strided_slice %16 {offsets = [0, 0], sizes = [8, 2], strides = [1, 1]} : vector<8x128xf32> to vector<8x2xf32>
    %c0_15 = arith.constant 0 : index
    %c0_16 = arith.constant 0 : index
    %18 = vector.load %arg6[%c0_15, %c0_16] : memref<8x2xf32, #tpu.memory_space<vmem>>, vector<8x2xf32>
    tpu.vector_store %arg6[%c0_15, %c0_16], %17 {strides = array<i32>} : memref<8x2xf32, #tpu.memory_space<vmem>>, vector<8x2xf32>,
    return
  }
  func.func @transform_0(%arg0: i32) -> (i32, i32) {
    %c0_i32 = arith.constant 0 : i32
    %c0_i32_0 = arith.constant 0 : i32
    return %arg0, %c0_i32 : i32, i32
  }
  func.func @transform_1(%arg0: i32) -> (i32, i32) {
    %c0_i32 = arith.constant 0 : i32
    %c0_i32_0 = arith.constant 0 : i32
    %c0_i32_1 = arith.constant 0 : i32
    return %c0_i32, %c0_i32_0 : i32, i32
  }
  func.func @transform_2(%arg0: i32) -> (i32, i32) {
    %c0_i32 = arith.constant 0 : i32
    %c0_i32_0 = arith.constant 0 : i32
    %c0_i32_1 = arith.constant 0 : i32
    return %c0_i32, %c0_i32_0 : i32, i32
  }
  func.func @transform_3(%arg0: i32) -> (i32, i32) {
    %c0_i32 = arith.constant 0 : i32
    %c0_i32_0 = arith.constant 0 : i32
    %c0_i32_1 = arith.constant 0 : i32
    return %c0_i32, %c0_i32_0 : i32, i32
  }
  func.func @transform_4(%arg0: i32) -> (i32, i32) {
    %c0_i32 = arith.constant 0 : i32
    %c0_i32_0 = arith.constant 0 : i32
    %c0_i32_1 = arith.constant 0 : i32
    return %c0_i32, %c0_i32_0 : i32, i32
  }
  func.func @transform_5(%arg0: i32) -> (i32, i32) {
    %c0_i32 = arith.constant 0 : i32
    %c0_i32_0 = arith.constant 0 : i32
    return %arg0, %c0_i32 : i32, i32
  }
}

</mosaic_0001>

<bundles_post_ra>
// kernel: tpu_custom_call.1
= control target key start
LH: loop header
LB: loop body
LE: loop exit
PB: predicated region body
PF: predicated region fallthrough
CT: control target
= control target key end

     0   :  { %10 = vsyncpa [#allocation4], 0  ;;  %s229_s21 = smov [#allocation3]   ;;  %s230_s23 = smov 64   ;;  %s280_s0 = inlined_call_operand.vmem [shape: f32[8,4], index: 0, kind: input, shape index: {}]   ;;  %s281_s1 = inlined_call_operand.vmem [shape: bf16[4,128], index: 1, kind: input, shape index: {}]   ;;  %s282_s2 = inlined_call_operand.vmem [shape: f32[1,128], index: 2, kind: input, shape index: {}]   ;;  %s283_s3 = inlined_call_operand.hbm [shape: bf16[128,128], index: 3, kind: input, shape index: {}]   ;;  %s284_s4 = inlined_call_operand.vmem [shape: f32[1,128], index: 4, kind: input, shape index: {}]   ;;  %s285_s5 = inlined_call_operand.vmem [shape: f32[8,2], index: 5, kind: output, shape index: {}]  }
   0x1   :  { %s21_s20 = sshll.u32 %s283_s3, 4  ;;  %s23_s22 = sshll.u32 %s229_s21, 4  ;;  %s22_s20 = int_to_ptr.hbm [resolvable:$true] %s21_s20  ;;  %s24_s22 = int_to_ptr.vmem [resolvable:$true] %s23_s22 }
   0x2   :  { %s231_s24 = smov 4  }
   0x3   :  { %29 = dma.hbm_to_vmem [thread:$0]  %s22_s20, 1024, %s24_s22, [#allocation4], %s230_s23, %s230_s23, %s231_s24  }
   0x4   :  { %227 = dma.done.wait [#allocation4], 1024  }
   0x5   :  { %228 = vsyncadd [#allocation4], 4294966272  ;;  %vm48_vm0 = vcmask 1041408   ;;  %v39_v0 = vld [vmem:[%s281_s1] sm:$0x3]  ;;  %vm44_vm1 = vcmask 31744  }
   0x6   :  { %v37_v1 = vld [vmem:[%s280_s0] sm:$0xff]  ;;  %v50_v3 = vsel %vm48_vm0, %v39_v0, 0  ;;  %v196_v5 = vld [vmem:[#allocation3 + $0x30] sm:$0xff]  ;;  %v195_v6 = vld [vmem:[#allocation3 + $0x28] sm:$0xff]  ;;  %vm150_vm2 = vcmask 15360  }
   0x7   :  { %v197_v2 = vld [vmem:[#allocation3 + $0x38] sm:$0xff]  ;;  %v38_v4 = vpack.c.bf16 %v37_v1, %v37_v1  ;;  %59 = vmatpush.bf16.msra.mxu0 %v50_v3  ;;  %v194_v7 = vld [vmem:[#allocation3 + $0x20] sm:$0xff]  ;;  %v192_v9 = vld [vmem:[#allocation3 + $0x10] sm:$0xff] }
   0x8   :  { %137 = vmatpush.bf16.msra.mxu1 %v197_v2  ;;  %v193_v8 = vld [vmem:[#allocation3 + $0x18] sm:$0xff]  ;;  %v191_v10 = vld [vmem:[#allocation3 + $0x8] sm:$0xff]  ;;  %v190_v11 = vld [vmem:[#allocation3] sm:$0xff] }
   0x9   :  { %v201_v12 = vld [vmem:[%s282_s2] ss:$0 sm:$0xff] }
   0xa   :  { %157 = vmatmul.msk.bf16.vlgmr.msra.gmra.mxu0 %vm44_vm1, %v38_v4  ;;  %v202_v19 = vld [vmem:[%s284_s4] ss:$0 sm:$0xff] }
   0xc   :  { %138 = vmatpush.bf16.msra.mxu1 %v196_v5 }
  0x10   :  { %139 = vmatpush.bf16.msra.mxu1 %v195_v6 }
  0x14   :  { %140 = vmatpush.bf16.msra.mxu1 %v194_v7 }
  0x18   :  { %141 = vmatpush.bf16.msra.mxu1 %v193_v8 }
  0x1c   :  { %142 = vmatpush.bf16.msra.mxu1 %v192_v9 }
  0x20   :  { %143 = vmatpush.bf16.msra.mxu1 %v191_v10 }
  0x24   :  { %144 = vmatpush.bf16.msra.mxu1 %v190_v11 }
  0x87   :  { %v61_v13 = vpop.f32.mrf.mxu0 }
  0x88   :  { %v62_v14 = vadd.f32 %v201_v12, %v61_v13 }
  0x8a   :  { %v65_v15 = vmax.f32 %v62_v14, 0.0 }
  0x8c   :  { %v66_v16 = vpack.c.bf16 %v65_v15, %v65_v15 }
  0x8e   :  { %67 = vst [vmem:[#allocation2] sm:$0xf] %v66_v16 }
  0x8f   :  { %v63_v17 = vpop.f32.mrf.mxu0 }
  0x95   :  { %v68_v18 = vld [vmem:[#allocation2] sm:$0xf] }
  0x96   :  { %145 = vmatmul.bf16.vlgmr.msra.gmra.mxu1 %v68_v18 }
 0x113   :  { %v146_v20 = vpop.f32.mrf.mxu1 }
 0x114   :  { %v147_v21 = vadd.f32 %v202_v19, %v146_v20 }
 0x116   :  { %151 = vst.msk [vmem:[%s285_s5] sm:$0xff] %vm150_vm2, %v147_v21 }
 0x11b   :  { %v148_v22 = vpop.f32.mrf.mxu1 }
 0x11c   :  { %156 = vsyncpa [#allocation4], 1 }

</bundles_post_ra>
